<compile_context>
chip_gen: v5e
topology: v5e:2x2
jax: 0.10.0
libtpu: 0.0.40
codegen_flags: <defaults>
</compile_context>

<pallas_src>
import jax
import jax.numpy as jnp
from jax.experimental import pallas as pl
from jax.experimental.pallas import tpu as pltpu


# ---------------------------------------------------------------------------
# Tiling helpers
# ---------------------------------------------------------------------------

# Conservative VMEM budget for all live blocks (before the 2x double-buffering
# applied below).  Keeps us well inside the 32 MiB default scoped-VMEM limit
# and far under v7x's 64 MiB physical VMEM, so no recompiles/spills per chip.
_VMEM_BUDGET_BYTES = 16 * 1024 * 1024


def _sublane_multiple(dtype) -> int:
    # Native sublane tiling: 8 (4-byte), 16 (2-byte), 32 (1-byte) dtypes.
    return max(8, 32 // jnp.dtype(dtype).itemsize)


def _pick_class_block(n_cls, per_class_bytes, shared_bytes) -> int:
    """Largest class batch C whose double-buffered blocks fit the VMEM budget."""
    usable = _VMEM_BUDGET_BYTES // 2 - shared_bytes  # /2: pipeline double-buffers
    c = max(1, usable // max(1, per_class_bytes))
    return int(min(n_cls, c))


# ---------------------------------------------------------------------------
# Kernel 1: full assembly (first call / cache build)
#   out[c] = [prefix[c] | ctx | suffix[c]]   for a batch of C classes per step
# ---------------------------------------------------------------------------

def _make_build_prompts(n_cls, n_ctx, suffix_len, ctx_dim, dtype):
    total_len = 1 + n_ctx + suffix_len
    itemsize = jnp.dtype(dtype).itemsize
    per_class = (1 + suffix_len + total_len) * ctx_dim * itemsize  # prefix+suffix+out
    shared = n_ctx * ctx_dim * itemsize                            # ctx block (shared)
    cblk = _pick_class_block(n_cls, per_class, shared)

    def kernel(prefix_ref, ctx_ref, suffix_ref, out_ref):
        # prefix_ref: (C, 1, D)   suffix_ref: (C, suffix_len, D)
        # ctx_ref:    (n_ctx, D)  -- shared (generic) learnable context
        # out_ref:    (C, total_len, D)
        ctx_b = jnp.broadcast_to(
            ctx_ref[...][None, :, :], (cblk, n_ctx, ctx_dim)
        ).astype(out_ref.dtype)
        # Assemble the whole block in registers -> one full-tile store.
        out_ref[...] = jnp.concatenate(
            [prefix_ref[...], ctx_b, suffix_ref[...]], axis=1)

    return pl.pallas_call(
        kernel,
        out_shape=jax.ShapeDtypeStruct((n_cls, total_len, ctx_dim), dtype),
        grid=(pl.cdiv(n_cls, cblk),),
        in_specs=[
            pl.BlockSpec((cblk, 1, ctx_dim), lambda i: (i, 0, 0)),
            pl.BlockSpec((n_ctx, ctx_dim), lambda i: (0, 0)),      # == expand()
            pl.BlockSpec((cblk, suffix_len, ctx_dim), lambda i: (i, 0, 0)),
        ],
        out_specs=pl.BlockSpec((cblk, total_len, ctx_dim), lambda i: (i, 0, 0)),
        compiler_params=pltpu.CompilerParams(dimension_semantics=("parallel",)),
    )


# ---------------------------------------------------------------------------
# Kernel 2: hot-path forward with cached prompts (frozen prefix/suffix).
#   The cached prompt tensor is aliased to the output; only the sublane-aligned
#   token block [0, t_blk) that contains the ctx slab is re-read/re-written.
#   Tokens >= t_blk (the frozen suffix bulk) are never touched.
# ---------------------------------------------------------------------------

def _make_update_ctx(n_cls, n_ctx, total_len, ctx_dim, dtype):
    sub = _sublane_multiple(dtype)
    t_blk = min(total_len, ((1 + n_ctx + sub - 1) // sub) * sub)  # aligned or full
    tail = t_blk - (1 + n_ctx)

    itemsize = jnp.dtype(dtype).itemsize
    per_class = 2 * t_blk * ctx_dim * itemsize     # aliased-in block + out block
    shared = n_ctx * ctx_dim * itemsize
    cblk = _pick_class_block(n_cls, per_class, shared)

    def kernel(base_ref, ctx_ref, out_ref):
        # base_ref/out_ref: (C, t_blk, D) -- same HBM buffer (aliased)
        # base holds [prefix | old ctx | first suffix tokens]; replace the ctx
        # slab with the new ctx and store the block with one full-tile store.
        ctx_b = jnp.broadcast_to(
            ctx_ref[...][None, :, :], (cblk, n_ctx, ctx_dim)
        ).astype(out_ref.dtype)
        pieces = [base_ref[:, :1, :], ctx_b]
        if tail > 0:
            pieces.append(base_ref[:, 1 + n_ctx:, :])
        out_ref[...] = jnp.concatenate(pieces, axis=1)

    return pl.pallas_call(
        kernel,
        out_shape=jax.ShapeDtypeStruct((n_cls, total_len, ctx_dim), dtype),
        grid=(pl.cdiv(n_cls, cblk),),
        in_specs=[
            pl.BlockSpec((cblk, t_blk, ctx_dim), lambda i: (i, 0, 0)),  # cached prompts
            pl.BlockSpec((n_ctx, ctx_dim), lambda i: (0, 0)),           # shared ctx
        ],
        out_specs=pl.BlockSpec((cblk, t_blk, ctx_dim), lambda i: (i, 0, 0)),
        # Output blocks cover only tokens [0, t_blk); the untouched suffix region
        # keeps its (frozen) contents because the buffer is aliased to input 0.
        input_output_aliases={0: 0},
        compiler_params=pltpu.CompilerParams(dimension_semantics=("parallel",)),
    )


# ---------------------------------------------------------------------------
# Wrapper mirroring FeaturedPromptLearner.forward() (generic-context case).
# ---------------------------------------------------------------------------

def featured_prompt_learner_forward(ctx, token_prefix, token_suffix,
                                    cached_prompts=None):
    """If `cached_prompts` is None, assemble the full prompt tensor.  Otherwise
    treat it as the previously assembled prompts (frozen prefix/suffix already
    in place) and rewrite only the ctx slab in place via output aliasing.
    In a real training loop the returned buffer is threaded back in as
    `cached_prompts` (ideally donated) every step."""
    # TODO(synk): class-specific contexts (CSC, ctx.ndim == 3) would only change
    # the ctx BlockSpec to a per-class block; generic context is handled here.
    assert ctx.ndim == 2, "generic (shared) context expected"
    n_cls, _, ctx_dim = token_prefix.shape
    n_ctx = ctx.shape[0]
    suffix_len = token_suffix.shape[1]
    total_len = 1 + n_ctx + suffix_len
    # Dtype consistency (review correctness note): avoid silent casts.
    assert ctx.dtype == token_prefix.dtype == token_suffix.dtype, "dtype mismatch"
    assert ctx.shape[1] == ctx_dim == token_suffix.shape[2]

    if cached_prompts is None:
        fn = _make_build_prompts(n_cls, n_ctx, suffix_len, ctx_dim, ctx.dtype)
        return fn(token_prefix, ctx, token_suffix)

    assert cached_prompts.shape == (n_cls, total_len, ctx_dim)
    assert cached_prompts.dtype == ctx.dtype
    fn = _make_update_ctx(n_cls, n_ctx, total_len, ctx_dim, ctx.dtype)
    return fn(cached_prompts, ctx)


if __name__ == "__main__":
    # Small synthetic configuration consistent with the module:
    #   n_cls classes, n_ctx learnable context tokens, ctx_dim embedding width,
    #   total tokenized length = 1 (prefix) + n_ctx + suffix_len.
    n_cls = 4
    n_ctx = 4
    ctx_dim = 128
    suffix_len = 11          # "<classname>, <feature>. <eos> <pad>..."
    dtype = jnp.float32      # bf16/fp16 also supported; halves HBM traffic

    key = jax.random.PRNGKey(0)
    k_ctx, k_ctx2, k_pre, k_suf = jax.random.split(key, 4)

    # nn.init.normal_(ctx_vectors, std=0.02) -> generic context (n_ctx, D)
    ctx = (0.02 * jax.random.normal(k_ctx, (n_ctx, ctx_dim))).astype(dtype)
    # frozen register_buffer token_prefix / token_suffix
    token_prefix = jax.random.normal(k_pre, (n_cls, 1, ctx_dim)).astype(dtype)
    token_suffix = jax.random.normal(k_suf, (n_cls, suffix_len, ctx_dim)).astype(dtype)
    # name_lens only control where the suffix is split before re-joining; the
    # concatenated result is independent of them (kept for fidelity).
    name_lens = [2, 1, 3, 2]

    def reference(ctx_val):
        ctx_exp = jnp.broadcast_to(ctx_val[None, :, :], (n_cls, n_ctx, ctx_dim))
        rows = []
        for i in range(n_cls):
            nl = name_lens[i]
            rows.append(jnp.concatenate(
                [token_prefix[i:i + 1], ctx_exp[i:i + 1],
                 token_suffix[i:i + 1, :nl + 1], token_suffix[i:i + 1, nl + 1:]],
                axis=1))
        return jnp.concatenate(rows, axis=0)

    # --- first forward: assemble the full prompts (class-batched kernel) ---
    prompts = featured_prompt_learner_forward(ctx, token_prefix, token_suffix)
    prompts = jax.block_until_ready(prompts)
    assert prompts.shape == (n_cls, 1 + n_ctx + suffix_len, ctx_dim), prompts.shape
    assert prompts.dtype == dtype
    assert jnp.allclose(prompts, reference(ctx)), "build kernel mismatch vs reference"

    # --- subsequent forward (ctx updated by the optimizer): in-place slab write ---
    ctx2 = (0.02 * jax.random.normal(k_ctx2, (n_ctx, ctx_dim))).astype(dtype)
    prompts2 = featured_prompt_learner_forward(
        ctx2, token_prefix, token_suffix, cached_prompts=prompts)
    prompts2 = jax.block_until_ready(prompts2)
    assert prompts2.shape == prompts.shape and prompts2.dtype == dtype
    assert jnp.allclose(prompts2, reference(ctx2)), "in-place kernel mismatch vs reference"

    print("KERNEL_OK")
</pallas_src>

<mosaic_0001>
module attributes {stable_mosaic.version = 11 : i64} {
  func.func @kernel(%arg0: i32, %arg1: memref<4x1x128xf32, #tpu.memory_space<vmem>>, %arg2: memref<4x128xf32, #tpu.memory_space<vmem>>, %arg3: memref<4x11x128xf32, #tpu.memory_space<vmem>>, %arg4: memref<4x16x128xf32, #tpu.memory_space<vmem>>) attributes {dimension_semantics = [#tpu.dimension_semantics<parallel>], iteration_bounds = array<i64: 1>, scalar_prefetch = 0 : i64, scratch_operands = 0 : i64, tpu.core_type = #tpu.core_type<tc>, window_params = [{transform_indices = @transform_0, window_bounds = array<i64: 4, 1, 128>}, {pipeline_mode = #tpu.pipeline_mode<synchronous>, transform_indices = @transform_1, window_bounds = array<i64: 4, 128>}, {transform_indices = @transform_2, window_bounds = array<i64: 4, 11, 128>}, {transform_indices = @transform_3, window_bounds = array<i64: 4, 16, 128>}]} {
    %c0 = arith.constant 0 : index
    %c0_0 = arith.constant 0 : index
    %0 = vector.load %arg2[%c0, %c0_0] : memref<4x128xf32, #tpu.memory_space<vmem>>, vector<4x128xf32>
    %1 = vector.shape_cast %0 : vector<4x128xf32> to vector<1x4x128xf32>
    %2 = vector.shape_cast %1 : vector<1x4x128xf32> to vector<1x4x128xf32>
    %3 = vector.broadcast %2 : vector<1x4x128xf32> to vector<4x4x128xf32>
    %c0_1 = arith.constant 0 : index
    %c0_2 = arith.constant 0 : index
    %c0_3 = arith.constant 0 : index
    %4 = vector.load %arg1[%c0_1, %c0_2, %c0_3] : memref<4x1x128xf32, #tpu.memory_space<vmem>>, vector<4x1x128xf32>
    %c0_4 = arith.constant 0 : index
    %c0_5 = arith.constant 0 : index
    %c0_6 = arith.constant 0 : index
    %5 = vector.load %arg3[%c0_4, %c0_5, %c0_6] : memref<4x11x128xf32, #tpu.memory_space<vmem>>, vector<4x11x128xf32>
    %6 = tpu.concatenate %4, %3, %5 in 1 : vector<4x1x128xf32>, vector<4x4x128xf32>, vector<4x11x128xf32> -> vector<4x16x128xf32>
    %c0_7 = arith.constant 0 : index
    %c0_8 = arith.constant 0 : index
    %c0_9 = arith.constant 0 : index
    %7 = vector.load %arg4[%c0_7, %c0_8, %c0_9] : memref<4x16x128xf32, #tpu.memory_space<vmem>>, vector<4x16x128xf32>
    tpu.vector_store %arg4[%c0_7, %c0_8, %c0_9], %6 {strides = array<i32>} : memref<4x16x128xf32, #tpu.memory_space<vmem>>, vector<4x16x128xf32>,
    return
  }
  func.func @transform_0(%arg0: i32) -> (i32, i32, i32) {
    %c0_i32 = arith.constant 0 : i32
    %c0_i32_0 = arith.constant 0 : i32
    %c0_i32_1 = arith.constant 0 : i32
    return %arg0, %c0_i32, %c0_i32_0 : i32, i32, i32
  }
  func.func @transform_1(%arg0: i32) -> (i32, i32) {
    %c0_i32 = arith.constant 0 : i32
    %c0_i32_0 = arith.constant 0 : i32
    %c0_i32_1 = arith.constant 0 : i32
    return %c0_i32, %c0_i32_0 : i32, i32
  }
  func.func @transform_2(%arg0: i32) -> (i32, i32, i32) {
    %c0_i32 = arith.constant 0 : i32
    %c0_i32_0 = arith.constant 0 : i32
    %c0_i32_1 = arith.constant 0 : i32
    return %arg0, %c0_i32, %c0_i32_0 : i32, i32, i32
  }
  func.func @transform_3(%arg0: i32) -> (i32, i32, i32) {
    %c0_i32 = arith.constant 0 : i32
    %c0_i32_0 = arith.constant 0 : i32
    %c0_i32_1 = arith.constant 0 : i32
    return %arg0, %c0_i32, %c0_i32_0 : i32, i32, i32
  }
}

</mosaic_0001>

<bundles_post_ra>
// kernel: tpu_custom_call.1
= control target key start
LH: loop header
LB: loop body
LE: loop exit
PB: predicated region body
PF: predicated region fallthrough
CT: control target
= control target key end

     0   :  { %vm39_vm0 = vcmask 1044480   ;;  %vm60_vm1 = vcmask 1040384   ;;  %s201_s0 = inlined_call_operand.vmem [shape: f32[4,1,128], index: 0, kind: input, shape index: {}]   ;;  %s202_s1 = inlined_call_operand.vmem [shape: f32[4,128], index: 1, kind: input, shape index: {}]   ;;  %s203_s2 = inlined_call_operand.vmem [shape: f32[4,11,128], index: 2, kind: input, shape index: {}]   ;;  %s204_s3 = inlined_call_operand.hbm [shape: f32[4,16,128], index: 3, kind: output, shape index: {}]  }
   0x1   :  { %v15_v0 = vld [vmem:[%s202_s1] sm:$0xf]  ;;  %v21_v5 = vld [vmem:[%s203_s2 + $0x8] sm:$0x7]  ;;  %v22_v6 = vld [vmem:[%s203_s2 + $0x10] sm:$0xff] }
   0x2   :  { %v16_v1 = vld [vmem:[%s201_s0] sm:$0x1]  ;;  %v29_v3 = vrot.slane %v15_v0, 7  ;;  %v41_v7 = vrot.slane %v21_v5, 3  ;;  %v17_v8 = vld [vmem:[%s201_s0 + $0x1] sm:$0x1] }
   0x3   :  { %v20_v2 = vld [vmem:[%s203_s2] sm:$0xff]  ;;  %v43_v9 = vrot.slane %v22_v6, 3  ;;  %v23_v10 = vld [vmem:[%s203_s2 + $0x18] sm:$0x7]  ;;  %v25_v16 = vld [vmem:[%s203_s2 + $0x28] sm:$0x7] }
   0x4   :  { %v40_v4 = vrot.slane %v20_v2, 3  ;;  %v61_v11 = vsel %vm60_vm1, %v16_v1, %v29_v3  ;;  %v62_v12 = vsel %vm60_vm1, %v17_v8, %v29_v3  ;;  %v44_v13 = vrot.slane %v23_v10, 3  ;;  %v18_v14 = vld [vmem:[%s201_s0 + $0x2] sm:$0x1]  ;;  %v19_v21 = vld [vmem:[%s201_s0 + $0x3] sm:$0x1] }
   0x5   :  { %v24_v15 = vld [vmem:[%s203_s2 + $0x20] sm:$0xff]  ;;  %v66_v19 = vsel %vm39_vm0, %v62_v12, %v43_v9  ;;  %v26_v22 = vld [vmem:[%s203_s2 + $0x30] sm:$0xff]  ;;  %v27_v23 = vld [vmem:[%s203_s2 + $0x38] sm:$0x7]  ;;  %v63_v25 = vsel %vm60_vm1, %v18_v14, %v29_v3  ;;  %v47_v26 = vrot.slane %v25_v16, 3 }
   0x6   :  { %v65_v17 = vsel %vm39_vm0, %v61_v11, %v40_v4  ;;  %v42_v18 = vsel %vm39_vm0, %v40_v4, %v41_v7  ;;  %v46_v20 = vrot.slane %v24_v15, 3  ;;  %v45_v24 = vsel %vm39_vm0, %v43_v9, %v44_v13 }
   0x7   :  { %69 = vst [vmem:[#allocation2] sm:$0xff] %v65_v17  ;;  %v49_v27 = vrot.slane %v26_v22, 3 }
   0x8   :  { %8 = vsyncpa [#allocation3], 0  ;;  %70 = vst [vmem:[#allocation2 + $0x8] sm:$0xff] %v42_v18  ;;  %v67_v28 = vsel %vm39_vm0, %v63_v25, %v46_v20  ;;  %v64_v29 = vsel %vm60_vm1, %v19_v21, %v29_v3  ;;  %v50_v30 = vrot.slane %v27_v23, 3  ;;  %s124_s0 = smov [#allocation2]   ;;  %s83_s2 = sshll.u32 %s204_s3, 4  ;;  %v48_v31 = vsel %vm39_vm0, %v46_v20, %v47_v26  ;;  %s84_s2 = int_to_ptr.hbm [resolvable:$true] %s83_s2 }
   0x9   :  { %s81_s10 = sshll.u32 %s124_s0, 4  ;;  %71 = vst [vmem:[#allocation2 + $0x10] sm:$0xff] %v66_v19  ;;  %v68_v32 = vsel %vm39_vm0, %v64_v29, %v49_v27  ;;  %s125_s13 = smov 128   ;;  %s82_s10 = int_to_ptr.vmem [resolvable:$true] %s81_s10 }
   0xa   :  { %72 = vst [vmem:[#allocation2 + $0x18] sm:$0xff] %v45_v24  ;;  %v51_v33 = vsel %vm39_vm0, %v49_v27, %v50_v30  ;;  %s126_s14 = smov 8  }
   0xb   :  { %73 = vst [vmem:[#allocation2 + $0x20] sm:$0xff] %v67_v28 }
   0xc   :  { %74 = vst [vmem:[#allocation2 + $0x28] sm:$0xff] %v48_v31 }
   0xd   :  { %75 = vst [vmem:[#allocation2 + $0x30] sm:$0xff] %v68_v32 }
   0xe   :  { %76 = vst [vmem:[#allocation2 + $0x38] sm:$0xff] %v51_v33 }
   0xf   :  { %89 = dma.vmem_to_hbm [thread:$0]  %s82_s10, 1024, %s84_s2, [#allocation3], %s125_s13, %s125_s13, %s126_s14  }
  0x10   :  { %122 = dma.done.wait [#allocation3], 1024  }
  0x11   :  { %123 = vsyncadd [#allocation3], 4294966272 }
  0x12   :  { %94 = vsyncpa [#allocation3], 1 }

</bundles_post_ra>
